<compile_context>
chip_gen: v7x
topology: tpu7x:2x2x1
jax: 0.10.0
libtpu: 0.0.40
codegen_flags: <defaults>
</compile_context>

<pallas_src>
import functools
import math

import jax
import jax.numpy as jnp
from jax import lax
from jax.experimental import pallas as pl
from jax.experimental.pallas import tpu as pltpu

_LANE = 128
_SUBLANE = 8
_NEG_BIAS = -1e9  # bias for padded action rows -> exp underflows to exactly 0


def _round_up(x, m):
    return ((x + m - 1) // m) * m


def _policy_kernel(x_ref, w1_ref, b1_ref, w2_ref, b2_ref, w3t_ref, b3t_ref, p_ref):
    # Layer 1 in f32: K = state_dim is tiny, MXU cost negligible, better numerics.
    h = jnp.dot(x_ref[...], w1_ref[...], preferred_element_type=jnp.float32) + b1_ref[...]
    h = jnp.maximum(h, 0.0).astype(jnp.bfloat16)

    # Layer 2: bf16 operands, f32 accumulation, f32 bias/relu boundary.
    h = jnp.dot(h, w2_ref[...], preferred_element_type=jnp.float32) + b2_ref[...]
    h = jnp.maximum(h, 0.0).astype(jnp.bfloat16)

    # Output layer computed transposed ("NT" matmul, same form as q @ k.T):
    #   logits_t[a, b] = sum_k w3t[a, k] * h[b, k]       -> (A_pad, tile_b)
    # Batch lands on the lane axis, so the final store is lane-dense and ~16x
    # smaller than a (tile_b, 128)-padded layout.
    logits_t = lax.dot_general(
        w3t_ref[...], h, (((1,), (1,)), ((), ())),
        preferred_element_type=jnp.float32) + b3t_ref[...]

    # Softmax along the (sublane) action axis; padded action rows carry a -1e9
    # bias so their exp is exactly 0 and they do not perturb the normalization.
    m = jnp.max(logits_t, axis=0, keepdims=True)
    e = jnp.exp(logits_t - m)
    s = jnp.sum(e, axis=0, keepdims=True)
    p_ref[...] = e * pl.reciprocal(s, approx=True)   # divide on the EUP slot


def prepare_params(params):
    """Pad params to TPU-friendly shapes; output layer is stored transposed.

    params: (w1, b1, w2, b2, w3, b3), weights stored (in, out), biases (out,), f32.
    Returns (prepped_params, action_dim). Call once, outside the jitted forward.
    """
    w1, b1, w2, b2, w3, b3 = params
    S, H1 = w1.shape
    H2 = w2.shape[1]
    A = w3.shape[1]
    H1p = _round_up(H1, _LANE)
    H2p = _round_up(H2, _LANE)
    A8 = _round_up(A, _SUBLANE)

    # Layer 1 kept f32; layers 2/3 bf16 matmul operands; biases f32.
    w1p = jnp.pad(w1.astype(jnp.float32), ((0, 0), (0, H1p - H1)))
    b1p = jnp.pad(b1.reshape(1, -1).astype(jnp.float32), ((0, 0), (0, H1p - H1)))
    w2p = jnp.pad(w2, ((0, H1p - H1), (0, H2p - H2))).astype(jnp.bfloat16)
    b2p = jnp.pad(b2.reshape(1, -1).astype(jnp.float32), ((0, 0), (0, H2p - H2)))
    # Output layer stored transposed (A_pad, H2p); padded action rows get -1e9 bias.
    w3tp = jnp.pad(w3.T, ((0, A8 - A), (0, H2p - H2))).astype(jnp.bfloat16)
    b3tp = jnp.pad(b3.reshape(-1, 1).astype(jnp.float32),
                   ((0, A8 - A), (0, 0)), constant_values=_NEG_BIAS)

    return (w1p, b1p, w2p, b2p, w3tp, b3tp), A


@functools.partial(jax.jit, static_argnames=("action_dim", "tile_b"))
def mlp_categorical_policy_forward(state, prepped, *, action_dim, tile_b=2048):
    """state: (B, state_dim) f32. Returns softmax probs (B, action_dim) f32."""
    w1, b1, w2, b2, w3t, b3t = prepped
    B, S = state.shape
    A8 = w3t.shape[0]

    # Tile selection:
    #  * small batch  -> one full-batch tile (block dims may equal full array dims)
    #  * large batch  -> lane-dense tiles (multiple of 128 for the transposed
    #    output store) with >=2 grid steps so v7x megacore can shard the batch.
    # No padding of the batch: grid = cdiv(B, tile); the last block overhangs and
    # Pallas masks its out-of-bounds writes.
    if B <= 2 * _LANE:
        tile = B
    else:
        tile = min(_round_up(tile_b, _LANE), _round_up(pl.cdiv(B, 2), _LANE))
    grid = pl.cdiv(B, tile)

    const = lambda a: pl.BlockSpec(a.shape, lambda i: (0,) * a.ndim)  # resident weights

    probs_t = pl.pallas_call(
        _policy_kernel,
        out_shape=jax.ShapeDtypeStruct((A8, B), jnp.float32),
        grid=(grid,),
        in_specs=[
            pl.BlockSpec((tile, S), lambda i: (i, 0)),
            const(w1), const(b1), const(w2), const(b2), const(w3t), const(b3t),
        ],
        out_specs=pl.BlockSpec((A8, tile), lambda i: (0, i)),
        compiler_params=pltpu.CompilerParams(dimension_semantics=("parallel",)),
    )(state, w1, b1, w2, b2, w3t, b3t)

    # Tiny (A8, B) slice + transpose back to (B, action_dim).
    return probs_t[:action_dim, :].T


def init_params(key, state_dim, action_dim, hidden_sizes=(64, 64)):
    """Xavier-uniform weights (gain=1), zero biases — matches weights_init_."""
    def xavier(k, fan_in, fan_out):
        bound = math.sqrt(6.0 / (fan_in + fan_out))
        # stored as (in, out); uniform is symmetric so transpose-equivalence holds
        return jax.random.uniform(k, (fan_in, fan_out), jnp.float32, -bound, bound)

    k1, k2, k3 = jax.random.split(key, 3)
    h0, h1 = hidden_sizes
    w1 = xavier(k1, state_dim, h0)
    b1 = jnp.zeros((h0,), jnp.float32)
    w2 = xavier(k2, h0, h1)
    b2 = jnp.zeros((h1,), jnp.float32)
    w3 = xavier(k3, h1, action_dim)
    b3 = jnp.zeros((action_dim,), jnp.float32)
    return (w1, b1, w2, b2, w3, b3)


def reference_forward(state, params):
    """Pure-JAX f32 reference mirroring the PyTorch module's forward."""
    w1, b1, w2, b2, w3, b3 = params
    h = jnp.maximum(state @ w1 + b1, 0.0)
    h = jnp.maximum(h @ w2 + b2, 0.0)
    return jax.nn.softmax(h @ w3 + b3, axis=-1)


if __name__ == "__main__":
    key = jax.random.PRNGKey(0)
    k_state, k_params = jax.random.split(key)

    batch, state_dim, action_dim = 8, 16, 4
    hidden_sizes = (64, 64)

    state = jax.random.normal(k_state, (batch, state_dim), jnp.float32)
    params = init_params(k_params, state_dim, action_dim, hidden_sizes)

    prepped, adim = prepare_params(params)
    probs = mlp_categorical_policy_forward(state, prepped, action_dim=adim)
    jax.block_until_ready(probs)

    probs_ref = reference_forward(state, params)
    assert probs.shape == (batch, action_dim)
    # bf16 operands in layers 2/3 -> compare against the f32 reference loosely.
    assert jnp.allclose(probs, probs_ref, atol=3e-2, rtol=3e-2)
    # rows must still be a valid categorical distribution (approx reciprocal -> 5e-3)
    assert jnp.allclose(jnp.sum(probs, axis=-1), 1.0, atol=5e-3)
    assert bool(jnp.all(probs >= 0.0))

    # TODO(synk): dist/log_prob/entropy/sample (torch.distributions.Categorical
    # helpers) are not part of forward() and are left to the host-side caller.

    print("KERNEL_OK")
</pallas_src>

<mosaic_0001>
module attributes {stable_mosaic.version = 11 : i64} {
  func.func @_policy_kernel(%arg0: i32, %arg1: memref<8x16xf32, #tpu.memory_space<vmem>>, %arg2: memref<16x128xf32, #tpu.memory_space<vmem>>, %arg3: memref<1x128xf32, #tpu.memory_space<vmem>>, %arg4: memref<128x128xbf16, #tpu.memory_space<vmem>>, %arg5: memref<1x128xf32, #tpu.memory_space<vmem>>, %arg6: memref<8x128xbf16, #tpu.memory_space<vmem>>, %arg7: memref<8x1xf32, #tpu.memory_space<vmem>>, %arg8: memref<8x8xf32, #tpu.memory_space<vmem>>) attributes {dimension_semantics = [#tpu.dimension_semantics<parallel>], iteration_bounds = array<i64: 1>, scalar_prefetch = 0 : i64, scratch_operands = 0 : i64, tpu.core_type = #tpu.core_type<tc>, window_params = [{transform_indices = @transform_0, window_bounds = array<i64: 8, 16>}, {pipeline_mode = #tpu.pipeline_mode<synchronous>, transform_indices = @transform_1, window_bounds = array<i64: 16, 128>}, {pipeline_mode = #tpu.pipeline_mode<synchronous>, transform_indices = @transform_2, window_bounds = array<i64: 1, 128>}, {pipeline_mode = #tpu.pipeline_mode<synchronous>, transform_indices = @transform_3, window_bounds = array<i64: 128, 128>}, {pipeline_mode = #tpu.pipeline_mode<synchronous>, transform_indices = @transform_4, window_bounds = array<i64: 1, 128>}, {pipeline_mode = #tpu.pipeline_mode<synchronous>, transform_indices = @transform_5, window_bounds = array<i64: 8, 128>}, {pipeline_mode = #tpu.pipeline_mode<synchronous>, transform_indices = @transform_6, window_bounds = array<i64: 8, 1>}, {transform_indices = @transform_7, window_bounds = array<i64: 8, 8>}]} {
    %c0 = arith.constant 0 : index
    %c0_0 = arith.constant 0 : index
    %0 = vector.load %arg1[%c0, %c0_0] : memref<8x16xf32, #tpu.memory_space<vmem>>, vector<8x16xf32>
    %c0_1 = arith.constant 0 : index
    %c0_2 = arith.constant 0 : index
    %1 = vector.load %arg2[%c0_1, %c0_2] : memref<16x128xf32, #tpu.memory_space<vmem>>, vector<16x128xf32>
    %cst = arith.constant dense<0.000000e+00> : vector<8x128xf32>
    %2 = tpu.matmul %0, %1, %cst {dimension_numbers = #tpu.dot_dimension_numbers<[1], [0], [0], [1], [0, 0, 1, 1], [], []>} : vector<8x16xf32>, vector<16x128xf32>, vector<8x128xf32> -> vector<8x128xf32>
    %c0_3 = arith.constant 0 : index
    %c0_4 = arith.constant 0 : index
    %3 = vector.load %arg3[%c0_3, %c0_4] : memref<1x128xf32, #tpu.memory_space<vmem>>, vector<1x128xf32>
    %4 = vector.broadcast %3 : vector<1x128xf32> to vector<8x128xf32>
    %5 = arith.addf %2, %4 : vector<8x128xf32>
    %cst_5 = arith.constant 0.000000e+00 : f32
    %6 = vector.broadcast %cst_5 : f32 to vector<8x128xf32>
    %7 = arith.maximumf %5, %6 : vector<8x128xf32>
    %8 = arith.truncf %7 : vector<8x128xf32> to vector<8x128xbf16>
    %c0_6 = arith.constant 0 : index
    %c0_7 = arith.constant 0 : index
    %9 = vector.load %arg4[%c0_6, %c0_7] : memref<128x128xbf16, #tpu.memory_space<vmem>>, vector<128x128xbf16>
    %cst_8 = arith.constant dense<0.000000e+00> : vector<8x128xf32>
    %10 = tpu.matmul %8, %9, %cst_8 {dimension_numbers = #tpu.dot_dimension_numbers<[1], [0], [0], [1], [0, 0, 1, 1], [], []>} : vector<8x128xbf16>, vector<128x128xbf16>, vector<8x128xf32> -> vector<8x128xf32>
    %c0_9 = arith.constant 0 : index
    %c0_10 = arith.constant 0 : index
    %11 = vector.load %arg5[%c0_9, %c0_10] : memref<1x128xf32, #tpu.memory_space<vmem>>, vector<1x128xf32>
    %12 = vector.broadcast %11 : vector<1x128xf32> to vector<8x128xf32>
    %13 = arith.addf %10, %12 : vector<8x128xf32>
    %cst_11 = arith.constant 0.000000e+00 : f32
    %14 = vector.broadcast %cst_11 : f32 to vector<8x128xf32>
    %15 = arith.maximumf %13, %14 : vector<8x128xf32>
    %16 = arith.truncf %15 : vector<8x128xf32> to vector<8x128xbf16>
    %c0_12 = arith.constant 0 : index
    %c0_13 = arith.constant 0 : index
    %17 = vector.load %arg6[%c0_12, %c0_13] : memref<8x128xbf16, #tpu.memory_space<vmem>>, vector<8x128xbf16>
    %cst_14 = arith.constant dense<0.000000e+00> : vector<8x8xf32>
    %18 = tpu.matmul %17, %16, %cst_14 {dimension_numbers = #tpu.dot_dimension_numbers<[1], [1], [0], [0], [0, 0, 1, 0], [], []>} : vector<8x128xbf16>, vector<8x128xbf16>, vector<8x8xf32> -> vector<8x8xf32>
    %c0_15 = arith.constant 0 : index
    %c0_16 = arith.constant 0 : index
    %19 = vector.load %arg7[%c0_15, %c0_16] : memref<8x1xf32, #tpu.memory_space<vmem>>, vector<8x1xf32>
    %20 = vector.broadcast %19 : vector<8x1xf32> to vector<8x8xf32>
    %21 = arith.addf %18, %20 : vector<8x8xf32>
    %cst_17 = arith.constant dense<0xFF800000> : vector<8xf32>
    %22 = vector.multi_reduction <maximumf>, %21, %cst_17 [0] : vector<8x8xf32> to vector<8xf32>
    %23 = vector.shape_cast %22 : vector<8xf32> to vector<1x8xf32>
    %24 = vector.broadcast %23 : vector<1x8xf32> to vector<8x8xf32>
    %25 = arith.subf %21, %24 : vector<8x8xf32>
    %26 = math.exp %25 : vector<8x8xf32>
    %cst_18 = arith.constant dense<0.000000e+00> : vector<8xf32>
    %27 = vector.multi_reduction <add>, %26, %cst_18 [0] : vector<8x8xf32> to vector<8xf32>
    %28 = vector.shape_cast %27 : vector<8xf32> to vector<1x8xf32>
    %29 = tpu.reciprocal %28 {approx = true} : vector<1x8xf32> -> vector<1x8xf32>
    %30 = vector.broadcast %29 : vector<1x8xf32> to vector<8x8xf32>
    %31 = arith.mulf %26, %30 : vector<8x8xf32>
    %c0_19 = arith.constant 0 : index
    %c0_20 = arith.constant 0 : index
    %32 = vector.load %arg8[%c0_19, %c0_20] : memref<8x8xf32, #tpu.memory_space<vmem>>, vector<8x8xf32>
    tpu.vector_store %arg8[%c0_19, %c0_20], %31 {strides = array<i32>} : memref<8x8xf32, #tpu.memory_space<vmem>>, vector<8x8xf32>,
    return
  }
  func.func @transform_0(%arg0: i32) -> (i32, i32) {
    %c0_i32 = arith.constant 0 : i32
    %c0_i32_0 = arith.constant 0 : i32
    return %arg0, %c0_i32 : i32, i32
  }
  func.func @transform_1(%arg0: i32) -> (i32, i32) {
    %c0_i32 = arith.constant 0 : i32
    %c0_i32_0 = arith.constant 0 : i32
    %c0_i32_1 = arith.constant 0 : i32
    return %c0_i32, %c0_i32_0 : i32, i32
  }
  func.func @transform_2(%arg0: i32) -> (i32, i32) {
    %c0_i32 = arith.constant 0 : i32
    %c0_i32_0 = arith.constant 0 : i32
    %c0_i32_1 = arith.constant 0 : i32
    return %c0_i32, %c0_i32_0 : i32, i32
  }
  func.func @transform_3(%arg0: i32) -> (i32, i32) {
    %c0_i32 = arith.constant 0 : i32
    %c0_i32_0 = arith.constant 0 : i32
    %c0_i32_1 = arith.constant 0 : i32
    return %c0_i32, %c0_i32_0 : i32, i32
  }
  func.func @transform_4(%arg0: i32) -> (i32, i32) {
    %c0_i32 = arith.constant 0 : i32
    %c0_i32_0 = arith.constant 0 : i32
    %c0_i32_1 = arith.constant 0 : i32
    return %c0_i32, %c0_i32_0 : i32, i32
  }
  func.func @transform_5(%arg0: i32) -> (i32, i32) {
    %c0_i32 = arith.constant 0 : i32
    %c0_i32_0 = arith.constant 0 : i32
    %c0_i32_1 = arith.constant 0 : i32
    return %c0_i32, %c0_i32_0 : i32, i32
  }
  func.func @transform_6(%arg0: i32) -> (i32, i32) {
    %c0_i32 = arith.constant 0 : i32
    %c0_i32_0 = arith.constant 0 : i32
    %c0_i32_1 = arith.constant 0 : i32
    return %c0_i32, %c0_i32_0 : i32, i32
  }
  func.func @transform_7(%arg0: i32) -> (i32, i32) {
    %c0_i32 = arith.constant 0 : i32
    %c0_i32_0 = arith.constant 0 : i32
    return %c0_i32, %arg0 : i32, i32
  }
}

</mosaic_0001>

<bundles_post_ra>
// kernel: mlp_categorical_policy_forward.1
= control target key start
LH: loop header
LB: loop body
LE: loop exit
PB: predicated region body
PF: predicated region fallthrough
CT: control target
= control target key end

     0   :  { %12 = vsyncpa [#allocation3], 0  ;;  %s558_s0 = inlined_call_operand.vmem [shape: f32[8,16], index: 0, kind: input, shape index: {}]   ;;  %s559_s1 = inlined_call_operand.hbm [shape: f32[16,128], index: 1, kind: input, shape index: {}]   ;;  %s560_s2 = inlined_call_operand.vmem [shape: f32[1,128], index: 2, kind: input, shape index: {}]   ;;  %s561_s3 = inlined_call_operand.hbm [shape: bf16[128,128], index: 3, kind: input, shape index: {}]   ;;  %s562_s4 = inlined_call_operand.vmem [shape: f32[1,128], index: 4, kind: input, shape index: {}]   ;;  %s563_s5 = inlined_call_operand.vmem [shape: bf16[8,128], index: 5, kind: input, shape index: {}]   ;;  %s564_s6 = inlined_call_operand.vmem [shape: f32[8,1], index: 6, kind: input, shape index: {}]   ;;  %s565_s7 = inlined_call_operand.vmem [shape: f32[8,8], index: 7, kind: output, shape index: {}]  }
   0x1   :  { %13 = vsyncpa [#allocation5], 0  ;;  %s460_s24 = smov [#allocation2]   ;;  %s412_s28 = scalar_lea.hbm %s559_s1, 256 }
   0x2   :  { %s21_s25 = sshll.u32 %s460_s24, 4  ;;  %p413_p0 = scmp.ne.s32.totalorder %s559_s1, %s412_s28  ;;  %s22_s25 = int_to_ptr.vmem [resolvable:$true] %s21_s25 }
   0x3   :  { %p416_p1 = scmp.lt.u32.totalorder %s412_s28, %s559_s1 }
   0x5   :  { %p418_p2 = pnand %p416_p1, %p413_p0 }
   0x7   :  { %421 = shalt.err (!%p418_p2)
}
   0x8   :  { %s422_s10 = scalar_lea.vmem %s22_s25, 256  ;;  %p427_p4 = scmp.lt.s32.totalorder %s22_s25, %s22_s25 }
   0x9   :  { %p423_p3 = scmp.ne.s32.totalorder %s22_s25, %s422_s10  ;;  %p428_p5 = scmp.lt.s32.totalorder %s422_s10, %s422_s10 }
   0xb   :  { %p429_p6 = por %p428_p5, %p427_p4 }
   0xd   :  { %p430_p7 = pnand %p429_p6, %p423_p3 }
   0xf   :  { %433 = shalt.err (!%p430_p7)
}
  0x10   :  { %s461_s11 = smov 128   ;;  %s462_s12 = smov 8  }
  0x11   :  { %27 = dma.hbm_to_vmem [thread:$0]  %s559_s1, 256, %s22_s25, [#allocation3], %s461_s11, %s461_s11, %s462_s12  }
  0x12   :  { %s463_s15 = smov [#allocation4]   ;;  %s434_s19 = scalar_lea.hbm %s561_s3, 1024 }
  0x13   :  { %s35_s16 = sshll.u32 %s463_s15, 4  ;;  %p435_p8 = scmp.ne.s32.totalorder %s561_s3, %s434_s19  ;;  %s36_s16 = int_to_ptr.vmem [resolvable:$true] %s35_s16 }
  0x14   :  { %p438_p9 = scmp.lt.u32.totalorder %s434_s19, %s561_s3 }
  0x16   :  { %p440_p10 = pnand %p438_p9, %p435_p8 }
  0x18   :  { %443 = shalt.err (!%p440_p10)
}
  0x19   :  { %s444_s24 = scalar_lea.vmem %s36_s16, 1024  ;;  %p449_p12 = scmp.lt.s32.totalorder %s36_s16, %s36_s16 }
  0x1a   :  { %p445_p11 = scmp.ne.s32.totalorder %s36_s16, %s444_s24  ;;  %p450_p13 = scmp.lt.s32.totalorder %s444_s24, %s444_s24 }
  0x1c   :  { %p451_p0 = por %p450_p13, %p449_p12 }
  0x1e   :  { %p452_p1 = pnand %p451_p0, %p445_p11 }
  0x20   :  { %455 = shalt.err (!%p452_p1)
}
  0x21   :  { %s464_s1 = smov 64   ;;  %s465_s25 = smov 4  }
  0x22   :  { %41 = dma.hbm_to_vmem [thread:$0]  %s561_s3, 1024, %s36_s16, [#allocation5], %s464_s1, %s464_s1, %s465_s25  }
  0x23   :  { %456 = dma.done.wait [#allocation3], 256  }
  0x24   :  { %457 = vsyncadd [#allocation3], 4294967040 }
  0x25   :  { %458 = dma.done.wait [#allocation5], 1024  }
  0x26   :  { %459 = vsyncadd [#allocation5], 4294966272  ;;  %v466_v0 = vmov 0.0|0.0   ;;  %vm467_vm0 = vmmov 0   ;;  %v468_v1 = vmov 0.0   ;;  %v56_v2 = vld [vmem:[#allocation2] sm:$0xff] }
  0x27   :  { %386 = vmatprep.subr.bf16.mxu0 %v466_v0  ;;  %357 = vmatprep.mubr.msk.f32.mxu0 %vm467_vm0, %v468_v1  ;;  %v57_v3 = vld [vmem:[#allocation2 + $0x8] sm:$0xff]  ;;  %v400_v5 = vld [vmem:[#allocation4] sm:$0xff]   ;;  %v55_v6 = vld [vmem:[%s558_s0] sm:$0xff]  ;;  %vm65_vm1 = vcmask 130048   ;;  %v469_v21 = vmov 0   ;;  %vm301_vm2 = vcmask 64512  }
  0x28   :  { %360 = vmatprep.subr.bf16.mxu1 %v468_v1  ;;  %376 = vmatprep.mubr.msk.bf16.mxu1 %vm467_vm0, %v468_v1  ;;  %v387_v4 = vpack.c.bf16 %v57_v3, %v56_v2  ;;  %v401_v7 = vld [vmem:[#allocation4 + $0x8] sm:$0xff]   ;;  %v402_v8 = vld [vmem:[#allocation4 + $0x10] sm:$0xff]   ;;  %v403_v9 = vld [vmem:[#allocation4 + $0x18] sm:$0xff]  }
  0x29   :  { %361 = vmatpush3.bf16.msra.mxu1 %v400_v5  ;;  %v404_v10 = vld [vmem:[#allocation4 + $0x20] sm:$0xff]   ;;  %v405_v11 = vld [vmem:[#allocation4 + $0x28] sm:$0xff]   ;;  %v406_v12 = vld [vmem:[#allocation4 + $0x30] sm:$0xff]   ;;  %399 = vset.pattern.permute.xlu0 %v469_v21 }
  0x2a   :  { %388 = vmatpush3.bf16.msra.mxu0 %v387_v4  ;;  %362 = vmatprep.subr.bf16.mxu1 %v468_v1  ;;  %v407_v13 = vld [vmem:[#allocation4 + $0x38] sm:$0xff]   ;;  %v328_v14 = vld [vmem:[%s560_s2] ss:$0 sm:$0xff] }
  0x2b   :  { %380 = vmatprep.subr.bf16.mxu0 %v468_v1  ;;  %v255_v20 = vld [vmem:[%s564_s6] sm:$0xff] }
  0x2c   :  { %258 = vperm.xlu0 %399, %v255_v20   ;;  %v330_v22 = vld [vmem:[%s562_s4] ss:$0 sm:$0xff] }
  0x2d   :  { %358 = vmatmul.mubr.msk.f32.vlgmr.msra.gmra.mrb[0].mxu0 %vm65_vm1, %v55_v6  ;;  %363 = vmatpush3.bf16.msra.mxu1 %v401_v7  ;;  %v254_v30 = vld [vmem:[%s563_s5] sm:$0xf] }
  0x2e   :  { %382 = vmatprep.mubr.msk.bf16.mxu0 %vm467_vm0, %v468_v1  ;;  %364 = vmatprep.subr.bf16.mxu1 %v468_v1 }
  0x31   :  { %365 = vmatpush3.bf16.msra.mxu1 %v402_v8 }
  0x32   :  { %366 = vmatprep.subr.bf16.mxu1 %v468_v1 }
  0x35   :  { %367 = vmatpush3.bf16.msra.mxu1 %v403_v9 }
  0x36   :  { %368 = vmatprep.subr.bf16.mxu1 %v468_v1 }
  0x39   :  { %369 = vmatpush3.bf16.msra.mxu1 %v404_v10 }
  0x3a   :  { %370 = vmatprep.subr.bf16.mxu1 %v468_v1 }
  0x3d   :  { %371 = vmatpush3.bf16.msra.mxu1 %v405_v11 }
  0x3e   :  { %372 = vmatprep.subr.bf16.mxu1 %v468_v1 }
  0x41   :  { %373 = vmatpush3.bf16.msra.mxu1 %v406_v12 }
  0x42   :  { %374 = vmatprep.subr.bf16.mxu1 %v468_v1 }
  0x45   :  { %375 = vmatpush3.bf16.msra.mxu1 %v407_v13 }
  0xab   :  { %v259_v31 = vpop.permute.xlu0 %258 }
 0x100   :  { %v135_v15 = vpop.f32.mrb[0].mxu0 }
 0x101   :  { %v136_v16 = vadd.f32 %v328_v14, %v135_v15  ;;  %v359_v17 = vpop.f32.mrb[1].mxu0 }
 0x103   :  { %v139_v18 = vmax.f32 %v136_v16, 0.0 }
 0x105   :  { %v140_v19 = vpack.c.bf16 %v139_v18, %v139_v18 }
 0x107   :  { %377 = vmatmul.mubr.bf16.vlgmr.msra.gmra.mrb[0].mxu1 %v140_v19 }
 0x1da   :  { %v246_v23 = vpop.f32.mrb[0].mxu1 }
 0x1db   :  { %v247_v24 = vadd.f32 %v330_v22, %v246_v23  ;;  %v378_v25 = vpop.f32.mrb[1].mxu1 }
 0x1dc   :  { %v249_v26 = vpop.f32.mrb[2].mxu1 }
 0x1dd   :  { %v252_v27 = vmax.f32 %v247_v24, 0.0  ;;  %v379_v28 = vpop.f32.mrb[3].mxu1 }
 0x1df   :  { %v253_v29 = vpack.c.bf16 %v252_v27, %v252_v27 }
 0x1e1   :  { %381 = vmatpush3.bf16.xpose.msra.mxu0 %v253_v29 }
 0x1e8   :  { %383 = vmatmul.mubr.bf16.vlgmr.msra.gmra.mrb[4].mxu0 %v254_v30 }
 0x2bb   :  { %v295_v32 = vpop.f32.mrb[4].mxu0 }
 0x2bc   :  { %v296_v33 = vadd.f32 %v295_v32, %v259_v31  ;;  %v384_v34 = vpop.f32.mrb[5].mxu0 }
 0x2bd   :  { %v298_v35 = vpop.f32.mrb[6].mxu0 }
 0x2be   :  { %v302_v36 = vsel %vm301_vm2, %v296_v33, -inf  ;;  %v385_v37 = vpop.f32.mrb[7].mxu0 }
 0x2bf   :  { %v303_v38 = vrot.slane %v302_v36, 4 }
 0x2c1   :  { %v304_v39 = vmax.f32 %v302_v36, %v303_v38 }
 0x2c3   :  { %v305_v40 = vrot.slane %v304_v39, 2 }
 0x2c5   :  { %v306_v41 = vmax.f32 %v304_v39, %v305_v40 }
 0x2c7   :  { %v307_v42 = vrot.slane %v306_v41, 1 }
 0x2c9   :  { %v308_v43 = vmax.f32 %v306_v41, %v307_v42 }
 0x2cb   :  { %v309_v44 = vsub.f32 %v296_v33, %v308_v43 }
 0x2cd   :  { %v310_v45 = vmul.f32 1.442695, %v309_v44 }
 0x2cf   :  { %408 = vpow2.f32 %v310_v45 }
 0x2d9   :  { %v409_v46 = vpop.eup %408 }
 0x2da   :  { %v312_v47 = vsel %vm301_vm2, %v409_v46, 0.0 }
 0x2db   :  { %v313_v48 = vrot.slane %v312_v47, 4 }
 0x2dd   :  { %v314_v49 = vadd.f32 %v313_v48, %v312_v47 }
 0x2df   :  { %v315_v50 = vrot.slane %v314_v49, 2 }
 0x2e1   :  { %v316_v51 = vadd.f32 %v315_v50, %v314_v49 }
 0x2e3   :  { %v317_v52 = vrot.slane %v316_v51, 1 }
 0x2e5   :  { %v318_v53 = vadd.f32 %v317_v52, %v316_v51 }
 0x2e7   :  { %410 = vrcp.f32 %v318_v53 }
 0x2f1   :  { %v411_v54 = vpop.eup %410 }
 0x2f2   :  { %v320_v55 = vmul.f32 %v411_v54, %v409_v46 }
 0x2f4   :  { %321 = vst.msk [vmem:[%s565_s7] sm:$0xff] %vm301_vm2, %v320_v55 }
 0x2f5   :  { %326 = vsyncpa [#allocation3], 1 }
 0x2f6   :  { %327 = vsyncpa [#allocation5], 1 }

</bundles_post_ra>
